<compile_context>
chip_gen: v6e
topology: v6e:2x2x1
jax: 0.10.0
libtpu: 0.0.40
codegen_flags: <defaults>
</compile_context>

<pallas_src>
import functools

import jax
import jax.numpy as jnp
from jax import lax
from jax.experimental import pallas as pl
from jax.experimental.pallas import tpu as pltpu


def _round_up(n, m):
    return ((n + m - 1) // m) * m


def _choose_tile(n_points, tile_n):
    """Pick a lane tile (multiple of 128) and the padded point count.

    Prefers zero padding beyond 128-alignment; only pads further (to a 512
    boundary) when no wide multiple-of-128 divisor of the padded extent exists,
    because lane-dense (>=512) output stores are the dominant mem-bound lever.
    """
    n128 = _round_up(n_points, 128)
    if n128 <= tile_n:
        return n128, n128
    best, t = 0, tile_n
    while t >= 128:
        if n128 % t == 0:
            best = t
            break
        t -= 128
    if best >= min(tile_n, 512):
        return best, n128                      # wide divisor, no extra padding
    t = min(tile_n, 512)
    return t, _round_up(n_points, t)           # small extra pad, wide stores


def _vq_kernel(x_ref, e_aug_ref, e_gat_ref, o_ref, run_min_ref):
    """One grid step: (C+1, tile) augmented points vs one (kc, C+1) codebook chunk.

    Grid = (batch, point tiles, K chunks); the K-chunk axis is a sequential
    reduction: a running min of the distance surrogate and a where-merge of the
    gathered codebook rows live in VMEM (scratch / resident output block).
    """
    kk = pl.program_id(2)

    @pl.when(kk == 0)
    def _init():
        run_min_ref[...] = jnp.full_like(run_min_ref, jnp.inf)

    x_aug = x_ref[0]                     # (C+1, tile), compute dtype; row C == 1
    e_aug = e_aug_ref[...]               # (kc, C+1),  compute dtype: [-2e | e2]

    # dist[k, n] = ||e_k||^2 - 2<e_k, x_n>  -- single MXU pass, f32 accumulate.
    dist = lax.dot_general(e_aug, x_aug, (((1,), (0,)), ((), ())),
                           preferred_element_type=jnp.float32)      # (kc, tile)

    kc = dist.shape[0]
    row = lax.broadcasted_iota(jnp.int32, dist.shape, 0)             # (kc, tile)
    lmin = jnp.min(dist, axis=0, keepdims=True)                      # (1, tile)
    # First-match tie-break within the chunk (same as torch.argmin); both
    # comparands come from the same f32 tensor, so exact-equality is safe.
    lidx = jnp.min(jnp.where(dist == lmin, row, kc), axis=0, keepdims=True)
    one_hot = (row == lidx).astype(jnp.float32)                      # (kc, tile)

    # Gather this chunk's winning rows on the MXU, in f32, so outputs are
    # bit-exact codebook rows.
    lzq = lax.dot_general(e_gat_ref[...], one_hot, (((0,), (0,)), ((), ())),
                          preferred_element_type=jnp.float32)        # (C, tile)

    # Merge with previous chunks: strict '<' keeps the earliest chunk on ties,
    # matching torch.argmin's first-occurrence rule globally.
    upd = lmin < run_min_ref[...]                                    # (1, tile)
    run_min_ref[...] = jnp.where(upd, lmin, run_min_ref[...])
    o_ref[0] = jnp.where(upd, lzq.astype(o_ref.dtype), o_ref[0])


@functools.partial(jax.jit, static_argnames=("tile_n", "compute_dtype", "k_chunk"))
def vector_quantize(z_e, embedding, *, tile_n=1024,
                    compute_dtype=jnp.bfloat16, k_chunk=None):
    """z_e: (B, C, H, W), embedding: (K, C) -> quantized z_q: (B, C, H, W)."""
    B, C, H, W = z_e.shape
    K, Ce = embedding.shape
    assert Ce == C, "embedding_dim must equal the channel dim of z_e"
    assert tile_n >= 128 and tile_n % 128 == 0

    out_dtype = z_e.dtype
    HW = H * W

    # --- point layout ------------------------------------------------------
    # Small-HW degenerate grids: fold batch into the lane/point axis so output
    # stores stay >=512 lanes wide (one cheap transpose; only for small HW).
    fold_batch = (B > 1) and (_round_up(HW, 128) < min(tile_n, 512))
    if fold_batch:
        n_points = B * HW
        x = jnp.moveaxis(z_e, 1, 0).reshape(1, C, n_points)     # (1, C, B*HW)
        b_eff = 1
    else:
        n_points = HW
        x = z_e.reshape(B, C, HW)                                # free reshape
        b_eff = B

    tile, n_pad = _choose_tile(n_points, tile_n)
    n_tiles = n_pad // tile

    # Single fused data-prep pass over x under jit: cast + ones-row (picks up
    # the ||e||^2 bias inside the distance matmul) + 128-alignment pad.
    x = x.astype(compute_dtype)
    ones = jnp.ones((b_eff, 1, n_points), compute_dtype)
    x_aug = jnp.concatenate([x, ones], axis=1)                   # (b, C+1, N)
    if n_pad != n_points:
        x_aug = jnp.pad(x_aug, ((0, 0), (0, 0), (0, n_pad - n_points)))

    # --- codebook layout ----------------------------------------------------
    k8 = _round_up(K, 8)
    if k_chunk is None:
        kc = k8 if k8 <= 1024 else 512          # bound (kc, tile) intermediates
    else:
        kc = min(_round_up(k_chunk, 8), k8)
    k_pad = _round_up(K, kc)
    n_kc = k_pad // kc

    e32 = embedding.astype(jnp.float32)
    e_aug = jnp.concatenate([-2.0 * e32,
                             jnp.sum(e32 * e32, axis=-1, keepdims=True)], axis=1)
    if k_pad != K:
        # Padded rows carry a huge bias sentinel so they can never win.
        pad_rows = jnp.zeros((k_pad - K, C + 1), jnp.float32).at[:, C].set(1e30)
        e_aug = jnp.concatenate([e_aug, pad_rows], axis=0)
    e_aug = e_aug.astype(compute_dtype)                           # (k_pad, C+1)

    e_gather = e32                                                # exact rows
    if k_pad != K:
        e_gather = jnp.pad(e_gather, ((0, k_pad - K), (0, 0)))    # (k_pad, C)

    # --- VMEM policy (generation-aware) --------------------------------------
    csz = jnp.dtype(compute_dtype).itemsize
    osz = jnp.dtype(out_dtype).itemsize
    est = (2 * (C + 1) * tile * csz        # x_aug blocks (double-buffered)
           + 2 * C * tile * osz            # output blocks
           + 2 * kc * (C + 1) * csz        # e_aug chunk buffers
           + 2 * kc * C * 4                # gather chunk buffers
           + 4 * kc * tile * 4             # dist / iota / one_hot temps
           + 3 * C * tile * 4              # lzq / select temps
           + 8 * tile * 4)                 # running-min scratch (padded)
    try:
        phys_vmem = pltpu.get_tpu_info().vmem_capacity_bytes
    except Exception:                       # unknown chip: assume 64 MiB (v7x)
        phys_vmem = 64 << 20
    cap = int(0.85 * phys_vmem)             # leave headroom, esp. on 64 MiB v7x
    vmem_limit = min(cap, max(32 << 20, 2 * est))

    n_total = b_eff * n_pad
    cost = pl.CostEstimate(
        flops=2 * (C + 1) * k_pad * n_total + 2 * C * k_pad * n_total,
        transcendentals=0,
        bytes_accessed=(n_total * (C + 1) * csz + n_total * C * osz
                        + k_pad * ((C + 1) * csz + C * 4)))

    grid = (b_eff, n_tiles, n_kc)           # K-chunk (reduction) axis last

    out = pl.pallas_call(
        _vq_kernel,
        out_shape=jax.ShapeDtypeStruct((b_eff, C, n_pad), out_dtype),
        grid_spec=pltpu.PrefetchScalarGridSpec(
            num_scalar_prefetch=0,
            grid=grid,
            in_specs=[
                pl.BlockSpec((1, C + 1, tile), lambda b, i, kk: (b, 0, i)),
                pl.BlockSpec((kc, C + 1), lambda b, i, kk: (kk, 0)),
                pl.BlockSpec((kc, C), lambda b, i, kk: (kk, 0)),
            ],
            out_specs=pl.BlockSpec((1, C, tile), lambda b, i, kk: (b, 0, i)),
            scratch_shapes=[pltpu.VMEM((1, tile), jnp.float32)],   # running min
        ),
        compiler_params=pltpu.CompilerParams(
            # First two axes parallel (megacore on v7x), K-chunk axis is the
            # sequential reduction with the resident output accumulator.
            dimension_semantics=("parallel", "parallel", "arbitrary"),
            vmem_limit_bytes=vmem_limit),
        cost_estimate=cost,
    )(x_aug, e_aug, e_gather)

    # Strip padding and restore NCHW.
    out = out[:, :, :n_points]
    if fold_batch:
        z_q = jnp.moveaxis(out.reshape(C, B, H, W), 0, 1)
    else:
        z_q = out.reshape(B, C, H, W)
    return z_q


def _reference(z_e, embedding):
    """Pure-JAX reference mirroring the PyTorch forward."""
    B, C, H, W = z_e.shape
    x = jnp.transpose(z_e, (0, 2, 3, 1)).reshape(-1, C)
    d = jnp.sum((x[:, None, :] - embedding[None, :, :]) ** 2, axis=2)
    idx = jnp.argmin(d, axis=1)
    zq = embedding[idx]
    return zq.reshape(B, H, W, C).transpose(0, 3, 1, 2)


def _check_nearest_codes(z_e, embedding, z_q, slack):
    """Every output must be an exact codebook row that is (near-)nearest."""
    B, C, H, W = z_e.shape
    x = jnp.transpose(z_e, (0, 2, 3, 1)).reshape(-1, C)
    q = jnp.transpose(z_q, (0, 2, 3, 1)).reshape(-1, C)
    is_row = jnp.any(jnp.all(q[:, None, :] == embedding[None, :, :], axis=-1), axis=-1)
    assert bool(jnp.all(is_row)), "output contains a non-codebook vector"
    d_sel = jnp.sum((x - q) ** 2, axis=-1)
    d_min = jnp.min(jnp.sum((x[:, None, :] - embedding[None, :, :]) ** 2, axis=-1), axis=-1)
    assert bool(jnp.all(d_sel <= d_min + slack)), "selected code is not nearest"


if __name__ == "__main__":
    # Module config: num_embedding=K, embedding_dim=C (small, synthetic).
    num_embedding = 8
    embedding_dim = 4
    B, H, W = 2, 16, 16

    key = jax.random.PRNGKey(0)
    k_emb, k_x, k_emb2 = jax.random.split(key, 3)

    # nn.Embedding weight init: uniform(-1/K, 1/K), shape (K, C).
    embedding = jax.random.uniform(
        k_emb, (num_embedding, embedding_dim), dtype=jnp.float32,
        minval=-1.0 / num_embedding, maxval=1.0 / num_embedding)
    z_e = jax.random.normal(k_x, (B, embedding_dim, H, W), dtype=jnp.float32)

    # 1) f32 distances: bit-identical argmin vs the PyTorch-style reference.
    z_q = jax.block_until_ready(
        vector_quantize(z_e, embedding, compute_dtype=jnp.float32))
    assert z_q.shape == z_e.shape
    assert jnp.allclose(z_q, _reference(z_e, embedding), atol=1e-5)

    # 2) Default bf16 distances (accepted approximation): outputs must still be
    #    exact codebook rows that are (near-)nearest to each point.
    z_q_bf16 = jax.block_until_ready(vector_quantize(z_e, embedding))
    _check_nearest_codes(z_e, embedding, z_q_bf16, slack=5e-2)

    # 3) Exercise the K-chunked reduction path with a larger codebook.
    emb_big = jax.random.uniform(
        k_emb2, (64, embedding_dim), dtype=jnp.float32, minval=-0.125, maxval=0.125)
    z_q_ck = jax.block_until_ready(
        vector_quantize(z_e, emb_big, compute_dtype=jnp.float32, k_chunk=16))
    _check_nearest_codes(z_e, emb_big, z_q_ck, slack=1e-3)

    print("KERNEL_OK")
</pallas_src>

<mosaic_0001>
module attributes {stable_mosaic.version = 11 : i64} {
  func.func @_vq_kernel(%arg0: i32, %arg1: i32, %arg2: i32, %arg3: memref<1x5x512xf32, #tpu.memory_space<vmem>>, %arg4: memref<8x5xf32, #tpu.memory_space<vmem>>, %arg5: memref<8x4xf32, #tpu.memory_space<vmem>>, %arg6: memref<1x4x512xf32, #tpu.memory_space<vmem>>, %arg7: memref<1x512xf32, #tpu.memory_space<vmem>>) attributes {dimension_semantics = [#tpu.dimension_semantics<parallel>, #tpu.dimension_semantics<parallel>, #tpu.dimension_semantics<arbitrary>], iteration_bounds = array<i64: 1, 1, 1>, scalar_prefetch = 0 : i64, scratch_operands = 1 : i64, tpu.core_type = #tpu.core_type<tc>, window_params = [{transform_indices = @transform_0, window_bounds = array<i64: 1, 5, 512>}, {transform_indices = @transform_1, window_bounds = array<i64: 8, 5>}, {transform_indices = @transform_2, window_bounds = array<i64: 8, 4>}, {transform_indices = @transform_3, window_bounds = array<i64: 1, 4, 512>}]} {
    %c0_i32 = arith.constant 0 : i32
    %0 = arith.cmpi eq, %arg2, %c0_i32 : i32
    %1 = arith.extui %0 : i1 to i32
    %c0_i32_0 = arith.constant 0 : i32
    %2 = arith.cmpi ne, %1, %c0_i32_0 : i32
    scf.if %2 {
      %cst_22 = arith.constant 0x7F800000 : f32
      %35 = vector.broadcast %cst_22 : f32 to vector<1x512xf32>
      %c0_23 = arith.constant 0 : index
      %c0_24 = arith.constant 0 : index
      %36 = vector.load %arg7[%c0_23, %c0_24] : memref<1x512xf32, #tpu.memory_space<vmem>>, vector<1x512xf32>
      tpu.vector_store %arg7[%c0_23, %c0_24], %35 {strides = array<i32>} : memref<1x512xf32, #tpu.memory_space<vmem>>, vector<1x512xf32>,
    } else {
    }
    %c0 = arith.constant 0 : index
    %c0_1 = arith.constant 0 : index
    %c0_2 = arith.constant 0 : index
    %3 = vector.load %arg3[%c0, %c0_1, %c0_2] : memref<1x5x512xf32, #tpu.memory_space<vmem>>, vector<1x5x512xf32>
    %4 = vector.shape_cast %3 : vector<1x5x512xf32> to vector<5x512xf32>
    %c0_3 = arith.constant 0 : index
    %c0_4 = arith.constant 0 : index
    %5 = vector.load %arg4[%c0_3, %c0_4] : memref<8x5xf32, #tpu.memory_space<vmem>>, vector<8x5xf32>
    %cst = arith.constant dense<0.000000e+00> : vector<8x512xf32>
    %6 = tpu.matmul %5, %4, %cst {dimension_numbers = #tpu.dot_dimension_numbers<[1], [0], [0], [1], [0, 0, 1, 1], [], []>} : vector<8x5xf32>, vector<5x512xf32>, vector<8x512xf32> -> vector<8x512xf32>
    %7 = tpu.iota {dimensions = array<i32: 0>} : vector<8x512xi32>
    %cst_5 = arith.constant dense<0x7F800000> : vector<512xf32>
    %8 = vector.multi_reduction <minimumf>, %6, %cst_5 [0] : vector<8x512xf32> to vector<512xf32>
    %9 = vector.shape_cast %8 : vector<512xf32> to vector<1x512xf32>
    %10 = vector.broadcast %9 : vector<1x512xf32> to vector<8x512xf32>
    %11 = arith.cmpf oeq, %6, %10 : vector<8x512xf32>
    %c8_i32 = arith.constant 8 : i32
    %12 = vector.broadcast %c8_i32 : i32 to vector<8x512xi32>
    %13 = arith.select %11, %7, %12 : vector<8x512xi1>, vector<8x512xi32>
    %cst_6 = arith.constant dense<2147483647> : vector<512xi32>
    %14 = vector.multi_reduction <minsi>, %13, %cst_6 [0] : vector<8x512xi32> to vector<512xi32>
    %15 = vector.shape_cast %14 : vector<512xi32> to vector<1x512xi32>
    %16 = vector.broadcast %15 : vector<1x512xi32> to vector<8x512xi32>
    %17 = arith.cmpi eq, %7, %16 : vector<8x512xi32>
    %18 = arith.extui %17 : vector<8x512xi1> to vector<8x512xi32>
    %19 = arith.sitofp %18 : vector<8x512xi32> to vector<8x512xf32>
    %c0_7 = arith.constant 0 : index
    %c0_8 = arith.constant 0 : index
    %20 = vector.load %arg5[%c0_7, %c0_8] : memref<8x4xf32, #tpu.memory_space<vmem>>, vector<8x4xf32>
    %cst_9 = arith.constant dense<0.000000e+00> : vector<4x512xf32>
    %21 = tpu.matmul %20, %19, %cst_9 {dimension_numbers = #tpu.dot_dimension_numbers<[0], [0], [1], [1], [0, 1, 1, 1], [], []>} : vector<8x4xf32>, vector<8x512xf32>, vector<4x512xf32> -> vector<4x512xf32>
    %c0_10 = arith.constant 0 : index
    %c0_11 = arith.constant 0 : index
    %22 = vector.load %arg7[%c0_10, %c0_11] : memref<1x512xf32, #tpu.memory_space<vmem>>, vector<1x512xf32>
    %23 = arith.cmpf olt, %9, %22 : vector<1x512xf32>
    %c0_12 = arith.constant 0 : index
    %c0_13 = arith.constant 0 : index
    %24 = vector.load %arg7[%c0_12, %c0_13] : memref<1x512xf32, #tpu.memory_space<vmem>>, vector<1x512xf32>
    %25 = arith.select %23, %9, %24 : vector<1x512xi1>, vector<1x512xf32>
    %c0_14 = arith.constant 0 : index
    %c0_15 = arith.constant 0 : index
    %26 = vector.load %arg7[%c0_14, %c0_15] : memref<1x512xf32, #tpu.memory_space<vmem>>, vector<1x512xf32>
    tpu.vector_store %arg7[%c0_14, %c0_15], %25 {strides = array<i32>} : memref<1x512xf32, #tpu.memory_space<vmem>>, vector<1x512xf32>,
    %c0_16 = arith.constant 0 : index
    %c0_17 = arith.constant 0 : index
    %c0_18 = arith.constant 0 : index
    %27 = vector.load %arg6[%c0_16, %c0_17, %c0_18] : memref<1x4x512xf32, #tpu.memory_space<vmem>>, vector<1x4x512xf32>
    %28 = vector.shape_cast %27 : vector<1x4x512xf32> to vector<4x512xf32>
    %29 = vector.shape_cast %23 : vector<1x512xi1> to vector<1x512xi1>
    %30 = vector.broadcast %29 : vector<1x512xi1> to vector<4x512xi1>
    %31 = arith.select %30, %21, %28 : vector<4x512xi1>, vector<4x512xf32>
    %c0_19 = arith.constant 0 : index
    %c0_20 = arith.constant 0 : index
    %c0_21 = arith.constant 0 : index
    %32 = vector.load %arg6[%c0_19, %c0_20, %c0_21] : memref<1x4x512xf32, #tpu.memory_space<vmem>>, vector<1x4x512xf32>
    %33 = vector.shape_cast %32 : vector<1x4x512xf32> to vector<4x512xf32>
    %34 = vector.shape_cast %31 : vector<4x512xf32> to vector<1x4x512xf32>
    tpu.vector_store %arg6[%c0_19, %c0_20, %c0_21], %34 {strides = array<i32>} : memref<1x4x512xf32, #tpu.memory_space<vmem>>, vector<1x4x512xf32>,
    return
  }
  func.func @transform_0(%arg0: i32, %arg1: i32, %arg2: i32) -> (i32, i32, i32) {
    %c0_i32 = arith.constant 0 : i32
    %c0_i32_0 = arith.constant 0 : i32
    return %arg0, %c0_i32, %arg1 : i32, i32, i32
  }
  func.func @transform_1(%arg0: i32, %arg1: i32, %arg2: i32) -> (i32, i32) {
    %c0_i32 = arith.constant 0 : i32
    %c0_i32_0 = arith.constant 0 : i32
    return %arg2, %c0_i32 : i32, i32
  }
  func.func @transform_2(%arg0: i32, %arg1: i32, %arg2: i32) -> (i32, i32) {
    %c0_i32 = arith.constant 0 : i32
    %c0_i32_0 = arith.constant 0 : i32
    return %arg2, %c0_i32 : i32, i32
  }
  func.func @transform_3(%arg0: i32, %arg1: i32, %arg2: i32) -> (i32, i32, i32) {
    %c0_i32 = arith.constant 0 : i32
    %c0_i32_0 = arith.constant 0 : i32
    return %arg0, %c0_i32, %arg1 : i32, i32, i32
  }
}

</mosaic_0001>

<bundles_post_ra>
// kernel: vector_quantize.1
= control target key start
LH: loop header
LB: loop body
LE: loop exit
PB: predicated region body
PF: predicated region fallthrough
CT: control target
= control target key end

     0   :  { %vm32_vm0 = vcmask 1044480   ;;  %vm28_vm1 = vcmask 39936   ;;  %v584_v3 = vmov 0.0   ;;  %v18_v7 = vlaneseq  ;;  %s731_s0 = inlined_call_operand.vmem [shape: f32[1,5,512], index: 0, kind: input, shape index: {}]   ;;  %s732_s1 = inlined_call_operand.vmem [shape: f32[8,5], index: 1, kind: input, shape index: {}]   ;;  %s733_s2 = inlined_call_operand.vmem [shape: f32[8,4], index: 2, kind: input, shape index: {}]   ;;  %s734_s3 = inlined_call_operand.vmem [shape: f32[1,4,512], index: 3, kind: output, shape index: {}]  }
   0x1   :  { %v24_v0 = vld [vmem:[%s731_s0 + $0x8] sm:$0x1f]  ;;  %v26_v1 = vld [vmem:[%s731_s0 + $0x18] sm:$0x1f]  ;;  %v23_v2 = vld [vmem:[%s731_s0] sm:$0x1f]  ;;  %109 = vmatprep.mubr.f32.mxu0 %v584_v3  ;;  %180 = vmatprep.mubr.f32.mxu1 %v584_v3 }
   0x2   :  { %562 = vmatprep.subr.msk.mxu0 %vm32_vm0, %v24_v0  ;;  %565 = vmatprep.subr.msk.mxu1 %vm32_vm0, %v26_v1  ;;  %v25_v4 = vld [vmem:[%s731_s0 + $0x10] sm:$0x1f]  ;;  %v27_v5 = vld [vmem:[%s732_s1] sm:$0xff]  ;;  %vm633_vm2 = vcmp.lt.s32.totalorder %v18_v7, 512  ;;  %v585_v9 = vmov inf   ;;  %v639_v20 = vshrl.u32 %v18_v7, 7 }
   0x3   :  { %v269_v6 = vld [vmem:[%s733_s2] sm:$0xff]  ;;  %563 = vmatpush1.msk.msra.mxu0 %vm32_vm0, %v23_v2  ;;  %566 = vmatpush1.msk.msra.mxu1 %vm32_vm0, %v25_v4  ;;  %22 = vst.msk [vmem:[#allocation2] sm:$0xf] %vm633_vm2, %v585_v9  ;;  %v586_v50 = vmov 1966171168  }
   0x4   :  { %564 = vmatmul.mubr.msk.f32.vlgmr.msra.gmra.mxu0 %vm28_vm1, %v27_v5  ;;  %567 = vmatmul.mubr.msk.f32.vlgmr.msra.gmra.mxu1 %vm28_vm1, %v27_v5  ;;  %v642_v29 = vsub.s32 0, %v639_v20  ;;  %v460_v44 = vsub.s32 2, %v639_v20  ;;  %v456_v45 = vsub.s32 1, %v639_v20  ;;  %v485_v51 = vunpack.c.l.s4 %v586_v50  ;;  %v512_v8 = vld [vmem:[%s734_s3] sm:$0xff] }
   0x5   :  { %270 = vxpose.xlu0.b32.start.end [1/1] (short) (narrow) %v269_v6, 8  ;;  %370 = vmatprep.mubr.f32.mxu0 %v584_v3  ;;  %v464_v52 = vsub.s32 3, %v639_v20 }
   0x6   :  { %441 = vmatprep.mubr.f32.mxu1 %v584_v3  ;;  %v486_v63 = vunpack.c.0.s8 %v485_v51 }
   0xa   :  { %v448_v34 = vld [vmem:[#allocation2] sm:$0xf] }
   0xb   :  { %v649_v39 = vrot.slane %v448_v34, %v642_v29  ;;  %v666_v57 = vrot.slane %v448_v34, %v460_v44  ;;  %v668_v58 = vrot.slane %v448_v34, %v456_v45  ;;  %v465_v0 = vrot.slane %v448_v34, %v464_v52 }
  0xc4   :  { %v111_v10 = vpop.f32.mrf.mxu0  ;;  %v182_v11 = vpop.f32.mrf.mxu1 }
  0xc5   :  { %v189_v12 = vrot.slane %v111_v10, 4  ;;  %v201_v13 = vrot.slane %v182_v11, 4 }
  0xc6   :  { %v113_v14 = vpop.f32.mrf.mxu0  ;;  %v184_v15 = vpop.f32.mrf.mxu1 }
  0xc7   :  { %v190_v16 = vmin.f32 %v111_v10, %v189_v12  ;;  %v202_v17 = vmin.f32 %v182_v11, %v201_v13  ;;  %v195_v18 = vrot.slane %v113_v14, 4  ;;  %v207_v19 = vrot.slane %v184_v15, 4 }
  0xc9   :  { %v191_v21 = vrot.slane %v190_v16, 2  ;;  %v203_v22 = vrot.slane %v202_v17, 2  ;;  %v196_v23 = vmin.f32 %v113_v14, %v195_v18  ;;  %v208_v24 = vmin.f32 %v184_v15, %v207_v19 }
  0xcb   :  { %v192_v25 = vmin.f32 %v190_v16, %v191_v21  ;;  %v204_v26 = vmin.f32 %v202_v17, %v203_v22  ;;  %v197_v27 = vrot.slane %v196_v23, 2  ;;  %v209_v28 = vrot.slane %v208_v24, 2  ;;  %v286_v21 = vpop.trf.xlu0 }
  0xcd   :  { %v193_v30 = vrot.slane %v192_v25, 1  ;;  %v205_v31 = vrot.slane %v204_v26, 1  ;;  %v198_v32 = vmin.f32 %v196_v23, %v197_v27  ;;  %v210_v33 = vmin.f32 %v208_v24, %v209_v28 }
  0xce   :  { %v587_v23 = vmov 1.0  }
  0xcf   :  { %v644_v35 = vmin.f32 %v192_v25, %v193_v30  ;;  %v646_v36 = vmin.f32 %v204_v26, %v205_v31  ;;  %v199_v37 = vrot.slane %v198_v32, 1  ;;  %v211_v38 = vrot.slane %v210_v33, 1 }
  0xd0   :  { %v588_v31 = vmov 0  }
  0xd1   :  { %vm213_vm3 = vcmp.eq.f32.partialorder %v111_v10, %v644_v35  ;;  %vm215_vm4 = vcmp.eq.f32.partialorder %v182_v11, %v646_v36  ;;  %v653_v40 = vmin.f32 %v198_v32, %v199_v37  ;;  %v655_v41 = vmin.f32 %v210_v33, %v211_v38 }
  0xd2   :  { %v217_v42 = vsel %vm213_vm3, %v639_v20, 8  ;;  %v219_v43 = vsel %vm215_vm4, %v639_v20, 8  ;;  %vm470_vm13 = vcmp.lt.f32.partialorder %v644_v35, %v649_v39  ;;  %v489_v11 = vsub.s32 %v486_v63, %v639_v20 }
  0xd3   :  { %v221_v46 = vrot.slane %v217_v42, 4  ;;  %v239_v47 = vrot.slane %v219_v43, 4  ;;  %vm214_vm5 = vcmp.eq.f32.partialorder %v113_v14, %v653_v40  ;;  %vm216_vm6 = vcmp.eq.f32.partialorder %v184_v15, %v655_v41 }
  0xd4   :  { %v218_v48 = vsel %vm214_vm5, %v639_v20, 8  ;;  %v220_v49 = vsel %vm216_vm6, %v639_v20, 8  ;;  %vm471_vm14 = vcmp.lt.f32.partialorder %v653_v40, %v668_v58  ;;  %v474_v15 = vsel %vm470_vm13, %v644_v35, %v649_v39  ;;  %v513_v35 = vld [vmem:[%s734_s3 + $0x8] sm:$0xff] }
  0xd5   :  { %vm222_vm7 = vcmp.lt.s32.totalorder %v217_v42, %v221_v46  ;;  %vm240_vm8 = vcmp.lt.s32.totalorder %v219_v43, %v239_v47  ;;  %v230_v53 = vrot.slane %v218_v48, 4  ;;  %v248_v54 = vrot.slane %v220_v49, 4 }
  0xd6   :  { %v223_v55 = vsel %vm222_vm7, %v217_v42, %v221_v46  ;;  %v241_v56 = vsel %vm240_vm8, %v219_v43, %v239_v47  ;;  %v475_v10 = vsel %vm471_vm14, %v653_v40, %v668_v58  ;;  %vm472_vm4 = vcmp.lt.f32.partialorder %v646_v36, %v666_v57 }
  0xd7   :  { %v224_v59 = vrot.slane %v223_v55, 2  ;;  %v242_v60 = vrot.slane %v241_v56, 2  ;;  %vm231_vm9 = vcmp.lt.s32.totalorder %v218_v48, %v230_v53  ;;  %vm249_vm10 = vcmp.lt.s32.totalorder %v220_v49, %v248_v54 }
  0xd8   :  { %v232_v61 = vsel %vm231_vm9, %v218_v48, %v230_v53  ;;  %v250_v62 = vsel %vm249_vm10, %v220_v49, %v248_v54  ;;  %v482_v17 = vcombine.low %v474_v15, %v475_v10  ;;  %vm302_vm7 = vcmask 64512  }
  0xd9   :  { %vm225_vm11 = vcmp.lt.s32.totalorder %v223_v55, %v224_v59  ;;  %vm243_vm12 = vcmp.lt.s32.totalorder %v241_v56, %v242_v60  ;;  %v233_v1 = vrot.slane %v232_v61, 2  ;;  %v251_v2 = vrot.slane %v250_v62, 2 }
  0xda   :  { %v226_v3 = vsel %vm225_vm11, %v223_v55, %v224_v59  ;;  %v244_v4 = vsel %vm243_vm12, %v241_v56, %v242_v60  ;;  %v476_v22 = vsel %vm472_vm4, %v646_v36, %v666_v57  ;;  %vm473_vm10 = vcmp.lt.f32.partialorder %v655_v41, %v465_v0 }
  0xdb   :  { %vm234_vm15 = vcmp.lt.s32.totalorder %v232_v61, %v233_v1  ;;  %vm252_vm0 = vcmp.lt.s32.totalorder %v250_v62, %v251_v2  ;;  %v227_v5 = vrot.slane %v226_v3, 1  ;;  %v245_v6 = vrot.slane %v244_v4, 1 }
  0xdc   :  { %v235_v7 = vsel %vm234_vm15, %v232_v61, %v233_v1  ;;  %v253_v9 = vsel %vm252_vm0, %v250_v62, %v251_v2  ;;  %v477_v24 = vsel %vm473_vm10, %v655_v41, %v465_v0  ;;  %v490_v25 = vrot.slane %v482_v17, %v489_v11 }
  0xdd   :  { %v236_v12 = vrot.slane %v235_v7, 1  ;;  %v254_v13 = vrot.slane %v253_v9, 1  ;;  %vm228_vm1 = vcmp.lt.s32.totalorder %v226_v3, %v227_v5  ;;  %vm246_vm3 = vcmp.lt.s32.totalorder %v244_v4, %v245_v6 }
  0xde   :  { %v229_v14 = vsel %vm228_vm1, %v226_v3, %v227_v5  ;;  %v247_v16 = vsel %vm246_vm3, %v244_v4, %v245_v6  ;;  %v483_v26 = vcombine.low %v476_v22, %v477_v24  ;;  %v516_v32 = vsel %vm472_vm4, 1, %v588_v31 }
  0xdf   :  { %vm237_vm5 = vcmp.lt.s32.totalorder %v235_v7, %v236_v12  ;;  %vm255_vm6 = vcmp.lt.s32.totalorder %v253_v9, %v254_v13  ;;  %vm257_vm11 = vcmp.eq.s32.totalorder %v639_v20, %v229_v14  ;;  %vm259_vm12 = vcmp.eq.s32.totalorder %v639_v20, %v247_v16 }
  0xe0   :  { %v238_v18 = vsel %vm237_vm5, %v235_v7, %v236_v12  ;;  %v256_v19 = vsel %vm255_vm6, %v253_v9, %v254_v13  ;;  %v497_v27 = vrot.slane %v483_v26, %v489_v11  ;;  %v515_v33 = vsel %vm471_vm14, 1, %v588_v31 }
  0xe1   :  { %vm258_vm8 = vcmp.eq.s32.totalorder %v639_v20, %v238_v18  ;;  %vm260_vm9 = vcmp.eq.s32.totalorder %v639_v20, %v256_v19  ;;  %v514_v20 = vsel %vm470_vm13, 1, %v588_v31  ;;  %v517_v34 = vsel %vm473_vm10, 1, %v588_v31 }
  0xe2   :  { %572 = vmatprep.subr.msk.mxu0 %vm258_vm8, %v587_v23  ;;  %575 = vmatprep.subr.msk.mxu1 %vm260_vm9, %v587_v23  ;;  %v498_v28 = vcombine.low %v490_v25, %v497_v27  ;;  %v521_v37 = vrot.slane %v514_v20, %v642_v29  ;;  %v529_v36 = vrot.slane %v516_v32, %v642_v29 }
  0xe3   :  { %573 = vmatpush1.msk.msra.mxu0 %vm257_vm11, %v587_v23  ;;  %576 = vmatpush1.msk.msra.mxu1 %vm259_vm12, %v587_v23  ;;  %v525_v38 = vrot.slane %v515_v33, %v642_v29  ;;  %v533_v39 = vrot.slane %v517_v34, %v642_v29  ;;  %v540_v40 = vcombine.high %v512_v8, %v512_v8 }
  0xe4   :  { %574 = vmatmul.mubr.msk.f32.vlgmr.msra.gmra.mxu0 %vm302_vm7, %v286_v21  ;;  %577 = vmatmul.mubr.msk.f32.vlgmr.msra.gmra.mxu1 %vm302_vm7, %v286_v21  ;;  %v505_v30 = vrot.slane %v498_v28, %v489_v11  ;;  %v541_v42 = vcombine.high %v513_v35, %v513_v35  ;;  %vm536_vm13 = vcmp.eq.s32.totalorder %v529_v36, 1 }
  0xe5   :  { %vm535_vm14 = vcmp.eq.s32.totalorder %v525_v38, 1  ;;  %vm537_vm15 = vcmp.eq.s32.totalorder %v533_v39, 1 }
  0xe6   :  { %511 = vst.msk [vmem:[#allocation2] sm:$0xf] %vm633_vm2, %v505_v30  ;;  %vm534_vm2 = vcmp.eq.s32.totalorder %v521_v37, 1 }
 0x1a4   :  { %v372_v41 = vpop.f32.mrf.mxu0  ;;  %v443_v43 = vpop.f32.mrf.mxu1 }
 0x1a5   :  { %v544_v46 = vsel %vm534_vm2, %v372_v41, %v512_v8  ;;  %v546_v47 = vsel %vm536_vm13, %v443_v43, %v513_v35 }
 0x1a6   :  { %v374_v44 = vpop.f32.mrf.mxu0  ;;  %v445_v45 = vpop.f32.mrf.mxu1 }
 0x1a7   :  { %v545_v48 = vsel %vm535_vm14, %v374_v44, %v540_v40  ;;  %v547_v49 = vsel %vm537_vm15, %v445_v45, %v541_v42 }
 0x1a8   :  { %v552_v50 = vcombine.low %v544_v46, %v545_v48  ;;  %v553_v51 = vcombine.low %v546_v47, %v547_v49 }
 0x1aa   :  { %556 = vst [vmem:[%s734_s3] sm:$0xff] %v552_v50  ;;  %557 = vst [vmem:[%s734_s3 + $0x8] sm:$0xff] %v553_v51 }

</bundles_post_ra>
